<compile_context>
chip_gen: v6e
topology: v6e:2x2x1
jax: 0.10.0
libtpu: 0.0.40
codegen_flags: <defaults>
</compile_context>

<pallas_src>
import functools

import jax
import jax.numpy as jnp
from jax.experimental import pallas as pl
from jax.experimental.pallas import tpu as pltpu


# ----------------------------------------------------------------------------
# helpers
# ----------------------------------------------------------------------------
def _round_up(v, m):
    return (v + m - 1) // m * m


def _pad_to(a, shape, dtype):
    a = a.astype(dtype)
    if a.shape == tuple(shape):
        return a  # already aligned: no extra HBM copy
    return jnp.zeros(shape, dtype).at[: a.shape[0], : a.shape[1]].set(a)


def _supports_buffered():
    if not hasattr(pl, "Buffered"):
        return False
    try:
        pl.BlockSpec((8, 128), lambda i: (0, 0), pipeline_mode=pl.Buffered(1))
        return True
    except Exception:
        return False


_HAS_BUFFERED = _supports_buffered()


def _invariant_spec(shape, index_map):
    """BlockSpec for a grid-invariant operand (single-buffered if supported)."""
    if _HAS_BUFFERED:
        return pl.BlockSpec(shape, index_map, pipeline_mode=pl.Buffered(1))
    return pl.BlockSpec(shape, index_map)


def _tpu_params():
    """Per-generation tiling / VMEM heuristics with a conservative fallback."""
    kind = ""
    try:
        kind = jax.devices()[0].device_kind.lower()
    except Exception:
        pass
    if "v2" in kind or "v3" in kind:
        return dict(vmem_bytes=16 << 20, n_cores=1, tile_m=256, bf16_valu=False)
    if "v4" in kind:
        return dict(vmem_bytes=128 << 20, n_cores=1, tile_m=512, bf16_valu=False)
    if "v5" in kind:   # v5e / v5p: 128 MiB VMEM, no bf16 VALU
        return dict(vmem_bytes=128 << 20, n_cores=1, tile_m=512, bf16_valu=False)
    if "v6" in kind:   # v6e: 128 MiB VMEM, bf16 VALU, 1 TC/chip
        return dict(vmem_bytes=128 << 20, n_cores=1, tile_m=1024, bf16_valu=True)
    if "7" in kind:    # v7x: 64 MiB VMEM per TC, bf16 VALU, 2 TC/chip
        return dict(vmem_bytes=64 << 20, n_cores=2, tile_m=512, bf16_valu=True)
    # Unknown: assume the most VMEM-constrained recent chip (v7x-like).
    return dict(vmem_bytes=64 << 20, n_cores=2, tile_m=512, bf16_valu=True)


# ----------------------------------------------------------------------------
# kernels
# ----------------------------------------------------------------------------
def _ffn_kernel_resident(x_ref, w1_ref, b1_ref, w2_ref, b2_ref, o_ref, *,
                         act_dtype):
    # One token tile per grid step; W1/b1/W2/b2 stay VMEM-resident across grid.
    #   x_ref: (TM, Hp)  w1_ref: (Hp, Mp)  b1_ref: (1, Mp) f32
    #   w2_ref: (Mp, Hp) b2_ref: (1, Hp) f32   o_ref: (TM, Hp)
    h = jnp.dot(x_ref[...], w1_ref[...], preferred_element_type=jnp.float32)
    h = jnp.maximum(h.astype(act_dtype) + b1_ref[...].astype(act_dtype), 0.0)
    y = jnp.dot(h.astype(w2_ref.dtype), w2_ref[...],
                preferred_element_type=jnp.float32)
    o_ref[...] = (y + b2_ref[...]).astype(o_ref.dtype)


def _ffn_kernel_stream(x_ref, w1_ref, b1_ref, w2_ref, b2_ref, o_ref, acc_ref, *,
                       act_dtype):
    # Per grid step (i = token tile, k = mid chunk):
    #   acc(f32, resident over k) += relu(x @ W1[:, k] + b1[k]) @ W2[k, :]
    k = pl.program_id(1)

    @pl.when(k == 0)
    def _init():
        # Seed the accumulator with the second bias (drops a VPU add later).
        acc_ref[...] = jnp.broadcast_to(b2_ref[...], acc_ref.shape)

    h = jnp.dot(x_ref[...], w1_ref[...], preferred_element_type=jnp.float32)
    h = jnp.maximum(h.astype(act_dtype) + b1_ref[...].astype(act_dtype), 0.0)
    acc_ref[...] += jnp.dot(h.astype(w2_ref.dtype), w2_ref[...],
                            preferred_element_type=jnp.float32)

    @pl.when(k == pl.num_programs(1) - 1)
    def _finalize():
        o_ref[...] = acc_ref[...].astype(o_ref.dtype)


# ----------------------------------------------------------------------------
# wrapper
# ----------------------------------------------------------------------------
def feed_forward_net(x, w1, b1, w2, b2, *, compute_dtype=jnp.bfloat16,
                     tile_m=None, tile_k=512, weights_resident=None):
    """Fused Linear -> ReLU -> [Dropout=identity] -> Linear.

    x: (..., hidden); w1: (hidden, mid); b1: (mid,)/(1, mid);
    w2: (mid, hidden); b2: (hidden,)/(1, hidden). Returns x.shape in x.dtype.

    compute_dtype feeds the MXU (bf16 default ~ matches PyTorch fp32 at ~1e-2
    relative level; pass jnp.float32 for exact-f32).  Accumulation is f32.
    weights_resident: None=auto (fit-in-VMEM check), True/False to force.
    """
    p = _tpu_params()
    orig_shape = x.shape
    hidden = orig_shape[-1]
    mid = w1.shape[-1]
    out_dtype = x.dtype
    compute_dtype = jnp.dtype(compute_dtype)
    act_dtype = (jnp.bfloat16
                 if (p["bf16_valu"] and compute_dtype == jnp.bfloat16)
                 else jnp.float32)

    x2d = x.reshape(-1, hidden)
    m_tokens = x2d.shape[0]

    cdt = compute_dtype.itemsize
    odt = jnp.dtype(out_dtype).itemsize
    sub = 8 if cdt >= 4 else 32 // cdt          # sublane packing (8 f32, 16 bf16)

    hp = _round_up(hidden, 128)                  # lane-dense output, full MXU N
    mp0 = _round_up(mid, 128)

    if tile_m is None:
        tile_m = p["tile_m"]
    # Token tile: keep >= n_cores tiles when possible so the "parallel" axis
    # shards across both TensorCores on v7x.
    per_core = -(-m_tokens // p["n_cores"])
    tm = _round_up(max(sub, min(tile_m, per_core)), sub)

    vmem_cap = min(100 << 20, int(p["vmem_bytes"] * 0.80))   # soft budget
    phys_cap = p["vmem_bytes"] - (4 << 20)                    # never hand out all
    wbuf = 1 if _HAS_BUFFERED else 2                          # resident-weight bufs

    def resident_need(tm_):
        return (2 * tm_ * hp * cdt                       # x tile (double-buffered)
                + wbuf * (hp * mp0 + mp0 * hp) * cdt     # W1 + W2 resident
                + wbuf * 8 * (mp0 + hp) * 4              # b1 + b2 (sublane pad, f32)
                + 2 * tm_ * hp * odt                     # out tile
                + tm_ * mp0 * 4)                         # (tm, mid) intermediate

    def stream_need(tm_, tk_):
        return (2 * tm_ * hp * cdt                       # x tile
                + 2 * (hp * tk_ + tk_ * hp) * cdt        # W1/W2 chunks
                + 2 * 8 * (tk_ + hp) * 4                 # bias chunks
                + 2 * tm_ * hp * odt                     # out tile
                + tm_ * hp * 4                           # f32 accumulator scratch
                + tm_ * tk_ * 4)                         # (tm, tk) intermediate

    use_resident = weights_resident
    if use_resident is None:
        use_resident = resident_need(tm) <= int(0.9 * vmem_cap)

    if use_resident:
        mp = mp0
        while tm > sub and resident_need(tm) > vmem_cap:
            tm = _round_up(tm // 2, sub)
        need = resident_need(tm)
    else:
        tk = _round_up(min(tile_k, mp0), 128)
        mp = _round_up(mid, tk)                  # pad mid up; do NOT shrink tk
        while stream_need(tm, tk) > vmem_cap and tm > sub:
            tm = _round_up(tm // 2, sub)
        while stream_need(tm, tk) > vmem_cap and tk > 128:
            tk = max(128, _round_up(tk // 2, 128))
            mp = _round_up(mid, tk)
        need = stream_need(tm, tk)

    mt = _round_up(m_tokens, tm)
    vmem_limit = int(min(max(need * 5 // 4, 32 << 20), phys_cap))

    # ---- padded operands (zero padding is exact for Linear->ReLU->Linear) ---
    xp = _pad_to(x2d, (mt, hp), compute_dtype)
    w1p = _pad_to(w1, (hp, mp), compute_dtype)
    b1p = _pad_to(jnp.reshape(b1, (1, -1)), (1, mp), jnp.float32)
    w2p = _pad_to(w2, (mp, hp), compute_dtype)
    b2p = _pad_to(jnp.reshape(b2, (1, -1)), (1, hp), jnp.float32)

    flops = 4 * mt * hp * mp                     # two matmuls, 2*M*K*N each

    if use_resident:
        grid = (mt // tm,)
        cost = pl.CostEstimate(
            flops=flops, transcendentals=0,
            bytes_accessed=int(xp.size * cdt + (w1p.size + w2p.size) * cdt
                               + (b1p.size + b2p.size) * 4 + mt * hp * odt))
        out = pl.pallas_call(
            functools.partial(_ffn_kernel_resident, act_dtype=act_dtype),
            out_shape=jax.ShapeDtypeStruct((mt, hp), out_dtype),
            grid_spec=pltpu.PrefetchScalarGridSpec(
                num_scalar_prefetch=0,
                grid=grid,
                in_specs=[
                    pl.BlockSpec((tm, hp), lambda i: (i, 0)),       # x tile
                    _invariant_spec((hp, mp), lambda i: (0, 0)),    # W1 (resident)
                    _invariant_spec((1, mp), lambda i: (0, 0)),     # b1
                    _invariant_spec((mp, hp), lambda i: (0, 0)),    # W2 (resident)
                    _invariant_spec((1, hp), lambda i: (0, 0)),     # b2
                ],
                out_specs=pl.BlockSpec((tm, hp), lambda i: (i, 0)),
            ),
            compiler_params=pltpu.CompilerParams(
                dimension_semantics=("parallel",),
                vmem_limit_bytes=vmem_limit),
            cost_estimate=cost,
        )(xp, w1p, b1p, w2p, b2p)
    else:
        grid = (mt // tm, mp // tk)
        cost = pl.CostEstimate(
            flops=flops, transcendentals=0,
            bytes_accessed=int(xp.size * cdt
                               + grid[0] * (w1p.size + w2p.size) * cdt
                               + (b1p.size + b2p.size) * 4 + mt * hp * odt))
        out = pl.pallas_call(
            functools.partial(_ffn_kernel_stream, act_dtype=act_dtype),
            out_shape=jax.ShapeDtypeStruct((mt, hp), out_dtype),
            grid_spec=pltpu.PrefetchScalarGridSpec(
                num_scalar_prefetch=0,
                grid=grid,
                in_specs=[
                    pl.BlockSpec((tm, hp), lambda i, k: (i, 0)),    # x tile
                    pl.BlockSpec((hp, tk), lambda i, k: (0, k)),    # W1 chunk
                    pl.BlockSpec((1, tk), lambda i, k: (0, k)),     # b1 chunk
                    pl.BlockSpec((tk, hp), lambda i, k: (k, 0)),    # W2 chunk
                    _invariant_spec((1, hp), lambda i, k: (0, 0)),  # b2 (invariant)
                ],
                out_specs=pl.BlockSpec((tm, hp), lambda i, k: (i, 0)),
                scratch_shapes=[pltpu.VMEM((tm, hp), jnp.float32)],
            ),
            compiler_params=pltpu.CompilerParams(
                dimension_semantics=("parallel", "arbitrary"),
                vmem_limit_bytes=vmem_limit),
            cost_estimate=cost,
        )(xp, w1p, b1p, w2p, b2p)

    return out[:m_tokens, :hidden].reshape(orig_shape)


# ----------------------------------------------------------------------------
# self-test
# ----------------------------------------------------------------------------
if __name__ == "__main__":
    key = jax.random.PRNGKey(0)

    # --- Test 1: toy module shapes (hidden=32, mid=64) ----------------------
    batch, seq, hidden, mid = 2, 8, 32, 64
    kx, kw1, kb1, kw2, kb2, k2 = jax.random.split(key, 6)
    x = jax.random.normal(kx, (batch, seq, hidden), dtype=jnp.float32)
    w1 = jax.random.normal(kw1, (hidden, mid), dtype=jnp.float32) * 0.05
    b1 = jax.random.normal(kb1, (1, mid), dtype=jnp.float32) * 0.01
    w2 = jax.random.normal(kw2, (mid, hidden), dtype=jnp.float32) * 0.05
    b2 = jax.random.normal(kb2, (1, hidden), dtype=jnp.float32) * 0.01

    y_ref = (jnp.maximum(x.reshape(-1, hidden) @ w1 + b1, 0.0) @ w2 + b2
             ).reshape(batch, seq, hidden)

    y_f32 = jax.block_until_ready(
        feed_forward_net(x, w1, b1, w2, b2, compute_dtype=jnp.float32))
    assert jnp.allclose(y_f32, y_ref, atol=1e-5, rtol=1e-5), "toy f32 mismatch"

    y_bf16 = jax.block_until_ready(feed_forward_net(x, w1, b1, w2, b2))
    assert jnp.allclose(y_bf16, y_ref, atol=2e-2, rtol=2e-2), "toy bf16 mismatch"

    # --- Test 2: larger shapes, force the k-streaming (weight-chunked) path --
    tokens2, hidden2, mid2 = 512, 256, 1024
    ka, kb, kc, kd, ke = jax.random.split(k2, 5)
    x2 = jax.random.normal(ka, (tokens2, hidden2), dtype=jnp.float32)
    w1_2 = jax.random.normal(kb, (hidden2, mid2), dtype=jnp.float32) * 0.03
    b1_2 = jax.random.normal(kc, (1, mid2), dtype=jnp.float32) * 0.01
    w2_2 = jax.random.normal(kd, (mid2, hidden2), dtype=jnp.float32) * 0.03
    b2_2 = jax.random.normal(ke, (1, hidden2), dtype=jnp.float32) * 0.01
    y2_ref = jnp.maximum(x2 @ w1_2 + b1_2, 0.0) @ w2_2 + b2_2

    y2 = jax.block_until_ready(
        feed_forward_net(x2, w1_2, b1_2, w2_2, b2_2,
                         tile_m=256, tile_k=512, weights_resident=False))
    assert jnp.allclose(y2, y2_ref, atol=5e-2, rtol=5e-2), "stream bf16 mismatch"

    y2f = jax.block_until_ready(
        feed_forward_net(x2, w1_2, b1_2, w2_2, b2_2,
                         compute_dtype=jnp.float32, weights_resident=False))
    assert jnp.allclose(y2f, y2_ref, atol=1e-4, rtol=1e-4), "stream f32 mismatch"

    # --- Test 3: same shapes, default auto path (weights-resident, bf16) -----
    y3 = jax.block_until_ready(feed_forward_net(x2, w1_2, b1_2, w2_2, b2_2))
    assert jnp.allclose(y3, y2_ref, atol=5e-2, rtol=5e-2), "resident bf16 mismatch"

    print("KERNEL_OK")
</pallas_src>

<mosaic_0001>
module attributes {stable_mosaic.version = 11 : i64} {
  func.func @_ffn_kernel_resident(%arg0: i32, %arg1: memref<8x128xf32, #tpu.memory_space<vmem>>, %arg2: memref<128x128xf32, #tpu.memory_space<vmem>>, %arg3: memref<1x128xf32, #tpu.memory_space<vmem>>, %arg4: memref<128x128xf32, #tpu.memory_space<vmem>>, %arg5: memref<1x128xf32, #tpu.memory_space<vmem>>, %arg6: memref<8x128xf32, #tpu.memory_space<vmem>>) attributes {dimension_semantics = [#tpu.dimension_semantics<parallel>], iteration_bounds = array<i64: 2>, scalar_prefetch = 0 : i64, scratch_operands = 0 : i64, tpu.core_type = #tpu.core_type<tc>, window_params = [{transform_indices = @transform_0, window_bounds = array<i64: 8, 128>}, {pipeline_mode = #tpu.pipeline_mode<synchronous>, transform_indices = @transform_1, window_bounds = array<i64: 128, 128>}, {pipeline_mode = #tpu.pipeline_mode<synchronous>, transform_indices = @transform_2, window_bounds = array<i64: 1, 128>}, {pipeline_mode = #tpu.pipeline_mode<synchronous>, transform_indices = @transform_3, window_bounds = array<i64: 128, 128>}, {pipeline_mode = #tpu.pipeline_mode<synchronous>, transform_indices = @transform_4, window_bounds = array<i64: 1, 128>}, {transform_indices = @transform_5, window_bounds = array<i64: 8, 128>}]} {
    %c0 = arith.constant 0 : index
    %c0_0 = arith.constant 0 : index
    %0 = vector.load %arg1[%c0, %c0_0] : memref<8x128xf32, #tpu.memory_space<vmem>>, vector<8x128xf32>
    %c0_1 = arith.constant 0 : index
    %c0_2 = arith.constant 0 : index
    %1 = vector.load %arg2[%c0_1, %c0_2] : memref<128x128xf32, #tpu.memory_space<vmem>>, vector<128x128xf32>
    %cst = arith.constant dense<0.000000e+00> : vector<8x128xf32>
    %2 = tpu.matmul %0, %1, %cst {dimension_numbers = #tpu.dot_dimension_numbers<[1], [0], [0], [1], [0, 0, 1, 1], [], []>} : vector<8x128xf32>, vector<128x128xf32>, vector<8x128xf32> -> vector<8x128xf32>
    %c0_3 = arith.constant 0 : index
    %c0_4 = arith.constant 0 : index
    %3 = vector.load %arg3[%c0_3, %c0_4] : memref<1x128xf32, #tpu.memory_space<vmem>>, vector<1x128xf32>
    %4 = vector.broadcast %3 : vector<1x128xf32> to vector<8x128xf32>
    %5 = arith.addf %2, %4 : vector<8x128xf32>
    %cst_5 = arith.constant 0.000000e+00 : f32
    %6 = vector.broadcast %cst_5 : f32 to vector<8x128xf32>
    %7 = arith.maximumf %5, %6 : vector<8x128xf32>
    %c0_6 = arith.constant 0 : index
    %c0_7 = arith.constant 0 : index
    %8 = vector.load %arg4[%c0_6, %c0_7] : memref<128x128xf32, #tpu.memory_space<vmem>>, vector<128x128xf32>
    %cst_8 = arith.constant dense<0.000000e+00> : vector<8x128xf32>
    %9 = tpu.matmul %7, %8, %cst_8 {dimension_numbers = #tpu.dot_dimension_numbers<[1], [0], [0], [1], [0, 0, 1, 1], [], []>} : vector<8x128xf32>, vector<128x128xf32>, vector<8x128xf32> -> vector<8x128xf32>
    %c0_9 = arith.constant 0 : index
    %c0_10 = arith.constant 0 : index
    %10 = vector.load %arg5[%c0_9, %c0_10] : memref<1x128xf32, #tpu.memory_space<vmem>>, vector<1x128xf32>
    %11 = vector.broadcast %10 : vector<1x128xf32> to vector<8x128xf32>
    %12 = arith.addf %9, %11 : vector<8x128xf32>
    %c0_11 = arith.constant 0 : index
    %c0_12 = arith.constant 0 : index
    %13 = vector.load %arg6[%c0_11, %c0_12] : memref<8x128xf32, #tpu.memory_space<vmem>>, vector<8x128xf32>
    tpu.vector_store %arg6[%c0_11, %c0_12], %12 {strides = array<i32>} : memref<8x128xf32, #tpu.memory_space<vmem>>, vector<8x128xf32>,
    return
  }
  func.func @transform_0(%arg0: i32) -> (i32, i32) {
    %c0_i32 = arith.constant 0 : i32
    %c0_i32_0 = arith.constant 0 : i32
    return %arg0, %c0_i32 : i32, i32
  }
  func.func @transform_1(%arg0: i32) -> (i32, i32) {
    %c0_i32 = arith.constant 0 : i32
    %c0_i32_0 = arith.constant 0 : i32
    %c0_i32_1 = arith.constant 0 : i32
    return %c0_i32, %c0_i32_0 : i32, i32
  }
  func.func @transform_2(%arg0: i32) -> (i32, i32) {
    %c0_i32 = arith.constant 0 : i32
    %c0_i32_0 = arith.constant 0 : i32
    %c0_i32_1 = arith.constant 0 : i32
    return %c0_i32, %c0_i32_0 : i32, i32
  }
  func.func @transform_3(%arg0: i32) -> (i32, i32) {
    %c0_i32 = arith.constant 0 : i32
    %c0_i32_0 = arith.constant 0 : i32
    %c0_i32_1 = arith.constant 0 : i32
    return %c0_i32, %c0_i32_0 : i32, i32
  }
  func.func @transform_4(%arg0: i32) -> (i32, i32) {
    %c0_i32 = arith.constant 0 : i32
    %c0_i32_0 = arith.constant 0 : i32
    %c0_i32_1 = arith.constant 0 : i32
    return %c0_i32, %c0_i32_0 : i32, i32
  }
  func.func @transform_5(%arg0: i32) -> (i32, i32) {
    %c0_i32 = arith.constant 0 : i32
    %c0_i32_0 = arith.constant 0 : i32
    return %arg0, %c0_i32 : i32, i32
  }
}

</mosaic_0001>

<bundles_post_ra>
// kernel: tpu_custom_call.1
= control target key start
LH: loop header
LB: loop body
LE: loop exit
PB: predicated region body
PF: predicated region fallthrough
CT: control target
= control target key end

     0   :  { %10 = vsyncpa [#allocation3], 0  ;;  %s1160_s0 = inlined_call_operand.hbm [shape: f32[16,128], index: 0, kind: input, shape index: {}]   ;;  %s1161_s1 = inlined_call_operand.hbm [shape: f32[128,128], index: 1, kind: input, shape index: {}]   ;;  %s1162_s2 = inlined_call_operand.vmem [shape: f32[1,128], index: 2, kind: input, shape index: {}]   ;;  %s1163_s3 = inlined_call_operand.hbm [shape: f32[128,128], index: 3, kind: input, shape index: {}]   ;;  %s1164_s4 = inlined_call_operand.vmem [shape: f32[1,128], index: 4, kind: input, shape index: {}]   ;;  %s1165_s5 = inlined_call_operand.hbm [shape: f32[16,128], index: 5, kind: output, shape index: {}]  }
   0x1   :  { %12 = vsyncpa [#allocation3 + $0x1], 0 }
   0x2   :  { %13 = vsyncpa [#allocation6], 0 }
   0x3   :  { %14 = vsyncpa [#allocation4], 0 }
   0x4   :  { %16 = vsyncpa [#allocation4 + $0x1], 0  ;;  %s942_s18 = smov 0   ;;  %s944_s19 = smov 0  }
   0x5   :  { %s946_s20 = smov 0   ;;  %s948_s21 = smov 0  }
   0x6 LB: > { %s963_s22 = sadd.s32 4294967295, %s902_s21   ;;  %s561_s23 = sadd.s32 4294967294, %s902_s21   ;;  %s902_s21 = sphi %s948_s21, %s1187_s21   ;;  %s898_s20 = sphi %s946_s20, %s1186_s20   ;;  %s894_s19 = sphi %s944_s19, %s1185_s19   ;;  %s890_s18 = sphi %s942_s18, %s1184_s18  }
   0x7   : > { %p42_p0 = scmp.ne.s32.totalorder %s894_s19, %s890_s18  ;;  %p1166_p1 = scmp.eq.s32.totalorder %s963_s22, 0 }
   0x8   : > { %p156_p3 = scmp.eq.s32.totalorder %s561_s23, 1  ;;  %p562_p5 = scmp.ge.s32.totalorder %s902_s21, 1 }
   0x9   : > { %p972_p4 = por %p1166_p1, %p42_p0  ;;  %p163_p7 = scmp.lt.s32.totalorder %s902_s21, 3 }
   0xa   : > { %p977_p6 = por %p156_p3, %p42_p0  ;;  %s904_s27 = smov [#allocation5]  }
   0xb   : > { %s1170_s24 = scalar_select %p972_p4, 1, 0 }
   0xc   : > { %s1171_s25 = scalar_select %p977_p6, 1, 0 }
   0xd   : > { %p982_p8 = pnand %p562_p5, %p163_p7  ;;  %s175_s28 = sshll.u32 %s904_s27, 4  ;;  %s176_s28 = int_to_ptr.vmem [resolvable:$true] %s175_s28 }
   0xe   : > { %s905_s30 = smov [#allocation7]   ;;  %s765_s7 = scalar_lea.vmem %s176_s28, 2048 }
   0xf   : > { %s1172_s26 = scalar_select %p982_p8, 1, 0 }
  0x10   : > { %p695_p9 = pneg %p982_p8  ;;  %s191_s6 = sshll.u32 %s905_s30, 4  ;;  %s192_s6 = int_to_ptr.vmem [resolvable:$true] %s191_s6 }
  0x11   : > { %p766_p13 = scmp.ne.s32.totalorder %s176_s28, %s765_s7  ;;  %p773_p5 = scmp.lt.s32.totalorder %s176_s28, %s176_s28 }
  0x12   : > { %p991_p11 = pnand %p695_p9, %p1166_p1  ;;  %p774_p7 = scmp.lt.s32.totalorder %s765_s7, %s765_s7 }
  0x14   : > { %p756_p12 = pneg %p991_p11  ;;  %p775_p10 = por %p774_p7, %p773_p5 }
  0x16   : > { %p768_p0 = pnand %p766_p13, %p756_p12 }
  0x18   : > { %p769_p3 = pneg %p768_p0 }
  0x1a   : > { %p776_p9 = pnand %p775_p10, %p769_p3 }
  0x1c   : > { %779 = shalt.err (!%p776_p9)
}
  0x1d   : > { %s906_s8 = smov 128   ;;  %s907_s9 = smov 8  }
  0x1e   : > { %698 = dma.hbm_to_vmem [thread:$0]  (!%p991_p11), %s1161_s1, 2048, %s176_s28, [#allocation6], %s906_s8, %s906_s8, %s907_s9  }
  0x1f   : > { %s791_s12 = scalar_lea.vmem %s192_s6, 2048  ;;  %p799_p2 = scmp.lt.s32.totalorder %s192_s6, %s192_s6 }
  0x20   : > { %p792_p1 = scmp.ne.s32.totalorder %s192_s6, %s791_s12  ;;  %p800_p6 = scmp.lt.s32.totalorder %s791_s12, %s791_s12 }
  0x22   : > { %p794_p13 = pnand %p792_p1, %p756_p12  ;;  %p801_p5 = por %p800_p6, %p799_p2 }
  0x24   : > { %p795_p0 = pneg %p794_p13 }
  0x26   : > { %p802_p10 = pnand %p801_p5, %p795_p0 }
  0x28   : > { %805 = shalt.err (!%p802_p10)
}
  0x29   : > { %701 = dma.hbm_to_vmem [thread:$0]  (!%p991_p11), %s1163_s3, 2048, %s192_s6, [#allocation6], %s906_s8, %s906_s8, %s907_s9  }
  0x2a   : > { %s1014_s15 = sadd.s32 1, %s902_s21   ;;  %s29_s16 = sadd.s32 1, %s898_s20 }
  0x2b   : > { %s26_s17 = ssub.s32 %s902_s21, %s1014_s15  ;;  %p36_p1 = scmp.ne.s32.totalorder %s898_s20, %s894_s19 }
  0x2c   : > { %p27_p2 = scmp.eq.s32.totalorder %s26_s17, 0  ;;  %p37_p6 = scmp.eq.s32.totalorder %s902_s21, 0 }
  0x2d   : > { %p1174_p12 = scmp.eq.s32.totalorder %s963_s22, 1  ;;  %p712_p7 = scmp.lt.s32.totalorder %s902_s21, 2 }
  0x2e   : > { %s1030_s27 = scalar_select %p27_p2, %s898_s20, %s29_s16  }
  0x2f   : > { %p1024_p3 = por %p1174_p12, %p36_p1  ;;  %p38_p9 = por %p37_p6, %p36_p1 }
  0x30   : > { %s208_s28 = sand.u32 1, %s898_s20   ;;  %s567_s30 = sshll.u32 %s902_s21, 7 }
  0x31   : > { %s1175_s23 = scalar_select %p1024_p3, 1, 0 }
  0x32   : > { %s566_s29 = sshll.u32 %s208_s28, 3  ;;  %s1037_s8 = scalar_lea.hbm %s1160_s0, %s567_s30 }
  0x33   : > { %s212_s9 = scalar_lea.vmem [#allocation2], %s566_s29  ;;  %p1039_p11 = pnand %p712_p7, %p38_p9 }
  0x34   : > { %s219_s10 = sshll.u32 %s212_s9, 4  ;;  %s209_s12 = scalar_lea.sflag [#allocation3], %s208_s28  ;;  %s220_s10 = int_to_ptr.vmem [resolvable:$true] %s219_s10 }
  0x35   : > { %s806_s13 = scalar_lea.hbm %s1037_s8, 128  ;;  %p808_p0 = pneg %p1039_p11 }
  0x36   : > { %p807_p13 = scmp.ne.s32.totalorder %s1037_s8, %s806_s13  ;;  %s811_s17 = scalar_lea.hbm %s1160_s0, 256 }
  0x37   : > { %p812_p1 = scmp.lt.s32.totalorder %s1037_s8, %s1160_s0  ;;  %p813_p2 = scmp.lt.s32.totalorder %s811_s17, %s806_s13 }
  0x38   : > { %p809_p5 = pnand %p808_p0, %p807_p13 }
  0x39   : > { %p814_p6 = por %p813_p2, %p812_p1 }
  0x3a   : > { %p810_p10 = pneg %p809_p5 }
  0x3c   : > { %p815_p12 = pnand %p814_p6, %p810_p10 }
  0x3e   : > { %818 = shalt.err (!%p815_p12)
}
  0x3f   : > { %s819_s6 = scalar_lea.vmem %s220_s10, 128  ;;  %s908_s28 = smov [#allocation2]  }
  0x40   : > { %p820_p7 = scmp.ne.s32.totalorder %s220_s10, %s819_s6  ;;  %s824_s7 = sshll.u32 %s908_s28, 4  ;;  %s825_s7 = int_to_ptr.vmem [resolvable:$false] %s824_s7 }
  0x41   : > { %s826_s9 = scalar_lea.vmem %s825_s7, 256  ;;  %p827_p13 = scmp.lt.s32.totalorder %s220_s10, %s825_s7 }
  0x42   : > { %p822_p9 = pnand %p820_p7, %p808_p0  ;;  %p828_p5 = scmp.lt.s32.totalorder %s826_s9, %s819_s6 }
  0x44   : > { %p823_p3 = pneg %p822_p9  ;;  %p829_p4 = por %p828_p5, %p827_p13 }
  0x46   : > { %p830_p8 = pnand %p829_p4, %p823_p3 }
  0x48   : > { %833 = shalt.err (!%p830_p8)
}
  0x49   : > { %705 = dma.hbm_to_vmem [thread:$0]  (!%p1039_p11), %s1037_s8, 128, %s220_s10, %s209_s12  }
  0x4a   : > { %p1177_p10 = scmp.ne.s32.totalorder %s1172_s26, 0 }
  0x4b   : > { %s1060_s13 = sand.u32 (!%p1177_p10), 1, %s894_s19   ;;  %p1178_p4 = scmp.ne.s32.totalorder (!%p1177_p10), %s1170_s24, 0 }
  0x4c   : > { %228 = sbr.rel (%p1177_p10) target bundleno = 524 (0x20c), region = 40  ;;  %s569_s14 = sshll.u32 (!%p1177_p10), %s1060_s13, 3 }
  0x4d   : > { %s231_s16 = scalar_lea.sflag (!%p1177_p10), [#allocation3], %s1060_s13  ;;  %s1066_s17 = scalar_lea.vmem (!%p1177_p10), [#allocation2], %s569_s14 }
  0x51   : > { %877 = dma.done.wait (%p1178_p4), %s231_s16, 128  }
  0x52   : > { %879 = vsyncadd (%p1178_p4), %s231_s16, 4294967168  ;;  %p1179_p8 = scmp.eq.s32.totalorder %s963_s22, 0 }
  0x54   : > { %881 = dma.done.wait (%p1179_p8), [#allocation6], 4096   ;;  %p1180_p3 = pmov %p1179_p8 }
  0x55   : > { %v909_v0 = vmov 0.0   ;;  %vm910_vm0 = vmmov 0   ;;  %v285_v1 = vld [vmem:[#allocation5 + $0x78] sm:$0xff]  ;;  %v284_v2 = vld [vmem:[#allocation5 + $0x70] sm:$0xff]  ;;  %v283_v3 = vld [vmem:[#allocation5 + $0x68] sm:$0xff]  ;;  %s576_s11 = sshll.u32 %s963_s22, 7 }
  0x56   : > { %883 = vsyncadd (%p1180_p3), [#allocation6], 4294963200  ;;  %613 = vmatprep.subr.mxu0 %v909_v0  ;;  %645 = vmatprep.mubr.msk.f32.mxu0 %vm910_vm0, %v909_v0  ;;  %v282_v4 = vld [vmem:[#allocation5 + $0x60] sm:$0xff]  ;;  %v379_v5 = vld [vmem:[#allocation7 + $0x78] sm:$0xff]  ;;  %s268_s12 = scalar_lea.vmem [#allocation8], %s569_s14  ;;  %s1123_s28 = scalar_lea.hbm %s1165_s5, %s576_s11 }
  0x57   : > { %648 = vmatprep.subr.mxu1 %v909_v0  ;;  %680 = vmatprep.mubr.msk.f32.mxu1 %vm910_vm0, %v909_v0  ;;  %v281_v6 = vld [vmem:[#allocation5 + $0x58] sm:$0xff]  ;;  %v378_v7 = vld [vmem:[#allocation7 + $0x70] sm:$0xff]  ;;  %v377_v8 = vld [vmem:[#allocation7 + $0x68] sm:$0xff]  ;;  %s472_s30 = sshll.u32 %s268_s12, 4  ;;  %s459_s7 = scalar_lea.sflag [#allocation4], %s1060_s13  ;;  %s473_s30 = int_to_ptr.vmem [resolvable:$true] %s472_s30 }
  0x58   : > { %614 = vmatpush3.msra.mxu0 %v285_v1  ;;  %649 = vmatpush3.msra.mxu1 %v379_v5  ;;  %v280_v9 = vld [vmem:[#allocation5 + $0x50] sm:$0xff]  ;;  %v376_v10 = vld [vmem:[#allocation7 + $0x60] sm:$0xff]  ;;  %v279_v11 = vld [vmem:[#allocation5 + $0x48] sm:$0xff]  ;;  %s834_s9 = scalar_lea.vmem %s473_s30, 128  ;;  %p1181_p0 = scmp.ne.s32.totalorder %s1175_s23, 0 }
  0x59   : > { %615 = vmatprep.subr.mxu0 %v909_v0  ;;  %650 = vmatprep.subr.mxu1 %v909_v0  ;;  %v375_v12 = vld [vmem:[#allocation7 + $0x58] sm:$0xff]  ;;  %v278_v13 = vld [vmem:[#allocation5 + $0x40] sm:$0xff]  ;;  %v374_v14 = vld [vmem:[#allocation7 + $0x50] sm:$0xff]  ;;  %p835_p11 = scmp.ne.s32.totalorder %s473_s30, %s834_s9  ;;  %s911_s22 = smov [#allocation8]  }
  0x5a   : > { %616 = vmatpush3.msra.mxu0 %v284_v2  ;;  %651 = vmatpush3.msra.mxu1 %v378_v7  ;;  %v277_v15 = vld [vmem:[#allocation5 + $0x38] sm:$0xff]  ;;  %v373_v16 = vld [vmem:[#allocation7 + $0x48] sm:$0xff]  ;;  %v276_v17 = vld [vmem:[#allocation5 + $0x30] sm:$0xff]  ;;  %s838_s16 = sshll.u32 %s911_s22, 4  ;;  %s839_s16 = int_to_ptr.vmem [resolvable:$false] %s838_s16 }
  0x5b   : > { %617 = vmatprep.subr.mxu0 %v909_v0  ;;  %652 = vmatprep.subr.mxu1 %v909_v0  ;;  %v372_v18 = vld [vmem:[#allocation7 + $0x40] sm:$0xff]  ;;  %v275_v19 = vld [vmem:[#allocation5 + $0x28] sm:$0xff]  ;;  %v371_v20 = vld [vmem:[#allocation7 + $0x38] sm:$0xff]  ;;  %p836_p1 = pnand %p835_p11, %p1181_p0  ;;  %s840_s14 = scalar_lea.vmem %s839_s16, 256 }
  0x5c   : > { %618 = vmatpush3.msra.mxu0 %v283_v3  ;;  %653 = vmatpush3.msra.mxu1 %v377_v8  ;;  %v274_v21 = vld [vmem:[#allocation5 + $0x20] sm:$0xff]  ;;  %v370_v22 = vld [vmem:[#allocation7 + $0x30] sm:$0xff]  ;;  %v273_v23 = vld [vmem:[#allocation5 + $0x18] sm:$0xff]  ;;  %p841_p6 = scmp.lt.s32.totalorder %s473_s30, %s839_s16  ;;  %p842_p12 = scmp.lt.s32.totalorder %s840_s14, %s834_s9 }
  0x5d   : > { %619 = vmatprep.subr.mxu0 %v909_v0  ;;  %654 = vmatprep.subr.mxu1 %v909_v0  ;;  %v369_v24 = vld [vmem:[#allocation7 + $0x28] sm:$0xff]  ;;  %v272_v25 = vld [vmem:[#allocation5 + $0x10] sm:$0xff]  ;;  %v368_v26 = vld [vmem:[#allocation7 + $0x20] sm:$0xff]  ;;  %p837_p2 = pneg %p836_p1 }
  0x5e   : > { %620 = vmatpush3.msra.mxu0 %v282_v4  ;;  %655 = vmatpush3.msra.mxu1 %v376_v10  ;;  %v271_v27 = vld [vmem:[#allocation5 + $0x8] sm:$0xff]  ;;  %v367_v28 = vld [vmem:[#allocation7 + $0x18] sm:$0xff]  ;;  %v270_v29 = vld [vmem:[#allocation5] sm:$0xff]  ;;  %p843_p7 = por %p842_p12, %p841_p6 }
  0x5f   : > { %621 = vmatprep.subr.mxu0 %v909_v0  ;;  %656 = vmatprep.subr.mxu1 %v909_v0  ;;  %v269_v30 = vld [vmem:[%s1066_s17] sm:$0xff]  ;;  %v365_v32 = vld [vmem:[#allocation7 + $0x8] sm:$0xff]  ;;  %v364_v33 = vld [vmem:[#allocation7] sm:$0xff] }
  0x60   : > { %622 = vmatpush3.msra.mxu0 %v281_v6  ;;  %657 = vmatpush3.msra.mxu1 %v375_v12  ;;  %v366_v31 = vld [vmem:[#allocation7 + $0x10] sm:$0xff]  ;;  %p844_p9 = pnand %p843_p7, %p837_p2 }
  0x61   : > { %623 = vmatprep.subr.mxu0 %v909_v0  ;;  %658 = vmatprep.subr.mxu1 %v909_v0  ;;  %v573_v34 = vld [vmem:[%s1162_s2] ss:$0 sm:$0xff] }
  0x62   : > { %624 = vmatpush3.msra.mxu0 %v280_v9  ;;  %659 = vmatpush3.msra.mxu1 %v374_v14  ;;  %v574_v39 = vld [vmem:[%s1164_s4] ss:$0 sm:$0xff] }
  0x63   : > { %625 = vmatprep.subr.mxu0 %v909_v0  ;;  %660 = vmatprep.subr.mxu1 %v909_v0 }
  0x64   : > { %626 = vmatpush3.msra.mxu0 %v279_v11  ;;  %661 = vmatpush3.msra.mxu1 %v373_v16 }
  0x65   : > { %627 = vmatprep.subr.mxu0 %v909_v0  ;;  %662 = vmatprep.subr.mxu1 %v909_v0 }
  0x66   : > { %628 = vmatpush3.msra.mxu0 %v278_v13  ;;  %663 = vmatpush3.msra.mxu1 %v372_v18 }
  0x67   : > { %629 = vmatprep.subr.mxu0 %v909_v0  ;;  %664 = vmatprep.subr.mxu1 %v909_v0 }
  0x68   : > { %630 = vmatpush3.msra.mxu0 %v277_v15  ;;  %665 = vmatpush3.msra.mxu1 %v371_v20 }
  0x69   : > { %631 = vmatprep.subr.mxu0 %v909_v0  ;;  %666 = vmatprep.subr.mxu1 %v909_v0 }
  0x6a   : > { %632 = vmatpush3.msra.mxu0 %v276_v17  ;;  %667 = vmatpush3.msra.mxu1 %v370_v22 }
  0x6b   : > { %633 = vmatprep.subr.mxu0 %v909_v0  ;;  %668 = vmatprep.subr.mxu1 %v909_v0 }
  0x6c   : > { %634 = vmatpush3.msra.mxu0 %v275_v19  ;;  %669 = vmatpush3.msra.mxu1 %v369_v24 }
  0x6d   : > { %635 = vmatprep.subr.mxu0 %v909_v0  ;;  %670 = vmatprep.subr.mxu1 %v909_v0 }
  0x6e   : > { %636 = vmatpush3.msra.mxu0 %v274_v21  ;;  %671 = vmatpush3.msra.mxu1 %v368_v26 }
  0x6f   : > { %637 = vmatprep.subr.mxu0 %v909_v0  ;;  %672 = vmatprep.subr.mxu1 %v909_v0 }
  0x70   : > { %638 = vmatpush3.msra.mxu0 %v273_v23  ;;  %673 = vmatpush3.msra.mxu1 %v367_v28 }
  0x71   : > { %639 = vmatprep.subr.mxu0 %v909_v0  ;;  %674 = vmatprep.subr.mxu1 %v909_v0 }
  0x72   : > { %640 = vmatpush3.msra.mxu0 %v272_v25  ;;  %675 = vmatpush3.msra.mxu1 %v366_v31 }
  0x73   : > { %641 = vmatprep.subr.mxu0 %v909_v0  ;;  %676 = vmatprep.subr.mxu1 %v909_v0 }
  0x74   : > { %642 = vmatpush3.msra.mxu0 %v271_v27  ;;  %677 = vmatpush3.msra.mxu1 %v365_v32 }
  0x75   : > { %643 = vmatprep.subr.mxu0 %v909_v0  ;;  %678 = vmatprep.subr.mxu1 %v909_v0 }
  0x76   : > { %644 = vmatpush3.msra.mxu0 %v270_v29  ;;  %679 = vmatpush3.msra.mxu1 %v364_v33 }
  0x77   : > { %646 = vmatmul.mubr.f32.vlgmr.msra.gmra.mxu0 %v269_v30 }
 0x137   : > { %v359_v35 = vpop.f32.mrf.mxu0 }
 0x138   : > { %v360_v36 = vadd.f32 %v573_v34, %v359_v35 }
 0x139   : > { %v647_v37 = vpop.f32.mrf.mxu0 }
 0x13a   : > { %v363_v38 = vmax.f32 %v360_v36, 0.0 }
 0x13c   : > { %681 = vmatmul.mubr.f32.vlgmr.msra.gmra.mxu1 %v363_v38 }
 0x1fc   : > { %v453_v40 = vpop.f32.mrf.mxu1 }
 0x1fd   : > { %v454_v41 = vadd.f32 %v574_v39, %v453_v40 }
 0x1fe   : > { %v682_v42 = vpop.f32.mrf.mxu1 }
 0x1ff   : > { %457 = vst [vmem:[%s268_s12] sm:$0xff] %v454_v41 }
 0x200   : > { %847 = shalt.err (!%p844_p9)
}
 0x201   : > { %s848_s17 = scalar_lea.hbm %s1123_s28, 128  ;;  %s852_s26 = scalar_lea.hbm %s1165_s5, 256 }
 0x202   : > { %p849_p13 = scmp.ne.s32.totalorder %s1123_s28, %s848_s17  ;;  %p853_p4 = scmp.lt.s32.totalorder %s1123_s28, %s1165_s5 }
 0x203   : > { %p854_p8 = scmp.lt.s32.totalorder %s852_s26, %s848_s17 }
 0x204   : > { %p850_p5 = pnand %p849_p13, %p1181_p0 }
 0x205   : > { %p855_p3 = por %p854_p8, %p853_p4 }
 0x206   : > { %p851_p10 = pneg %p850_p5 }
 0x208   : > { %p856_p11 = pnand %p855_p3, %p851_p10 }
 0x20a   : > { %859 = shalt.err (!%p856_p11)
}
 0x20b   : > { %693 = dma.vmem_to_hbm [thread:$0]  (%p1181_p0), %s473_s30, 128, %s1123_s28, %s459_s7  }
 0x20c PF: > { %s484_s11 = sand.u32 1, %s890_s18   ;;  %p1182_p1 = scmp.ne.s32.totalorder %s1171_s25, 0 }
 0x20d   : > { %p1183_p2 = scmp.ge.s32.totalorder %s902_s21, 2  ;;  %s485_s12 = scalar_lea.sflag [#allocation4], %s484_s11 }
 0x20f   : > { %p707_p6 = pnand %p1183_p2, %p1182_p1 }
 0x211   : > { %p708_p12 = pneg %p707_p6 }
 0x213   : > { %885 = dma.done.wait (%p708_p12), %s485_s12, 128  }
 0x214   : > { %887 = vsyncadd (%p708_p12), %s485_s12, 4294967168  ;;  %p19_p7 = scmp.ge.s32.totalorder %s1014_s15, 4   ;;  %s1184_s18 = smov %s894_s19 }
 0x215   : > { %s1185_s19 = smov %s898_s20  ;;  %s1186_s20 = smov %s1030_s27 }
 0x216   : > { %s1187_s21 = smov %s1014_s15  ;;  %21 = sbr.rel (!%p19_p7) target bundleno = 6 (0x6), region = 93 }
 0x21b   :  { %490 = vsyncpa [#allocation3], 1 }
 0x21c   :  { %492 = vsyncpa [#allocation3 + $0x1], 1 }
 0x21d   :  { %493 = vsyncpa [#allocation6], 1 }
 0x21e   :  { %494 = vsyncpa [#allocation4], 1 }
 0x21f   :  { %496 = vsyncpa [#allocation4 + $0x1], 1 }

</bundles_post_ra>
